<compile_context>
chip_gen: v7x
topology: tpu7x:2x2x1
jax: 0.10.0
libtpu: 0.0.40
codegen_flags: <defaults>
</compile_context>

<pallas_src>
import math

import jax
import jax.numpy as jnp
from jax import lax
from jax.experimental import pallas as pl
from jax.experimental.pallas import tpu as pltpu


def _make_sin_pos_emb_kernel(half_dim, width, scale, out_dtype):
    """Build the kernel as a closure over static shape / constant params.

    t_ref: (tb, 1)      f32 timestep tile
    o_ref: (tb, width)  out_dtype; columns [0, 2*half_dim) hold the exact
                        torch cat(sin, cos) layout, columns beyond are lane
                        padding (finite values, stripped in the wrapper).
    """
    half_pi = math.pi / 2.0

    def kernel(t_ref, o_ref):
        # Fused frequency / phase rows, generated in-kernel (no freq DMA):
        #   col <  half_dim  -> freq = exp(-scale*col),            phase = 0     (sin half)
        #   col >= half_dim  -> freq = exp(-scale*(col-half_dim)),  phase = pi/2  (cos half)
        # Padding columns (col >= 2*half_dim) yield finite garbage only.
        col = lax.broadcasted_iota(jnp.int32, (1, width), 1)
        in_cos = col >= half_dim
        idx = jnp.where(in_cos, col - half_dim, col).astype(jnp.float32)
        freqs = jnp.exp(idx * jnp.float32(-scale))                 # (1, width)
        phase = jnp.where(in_cos, jnp.float32(half_pi), jnp.float32(0.0))

        t = t_ref[...]                                             # (tb, 1)
        # VPU broadcast outer product; deliberately NOT an MXU matmul.
        emb = t * freqs + phase                                    # (tb, width)
        o_ref[...] = jnp.sin(emb).astype(out_dtype)                # single full-lane store

    return kernel


def sinusoidal_pos_emb_pallas(x, dim, *, out_dtype=jnp.float32):
    """x: (B,) timesteps. Returns (B, 2*(dim//2)) == torch.cat(sin, cos, -1)."""
    assert x.ndim == 1, "SinusoidalPosEmb expects a 1-D timestep tensor"
    half_dim = dim // 2
    assert half_dim >= 2, "dim must be >= 4 (module divides by half_dim - 1)"

    b = x.shape[0]
    out_dim = 2 * half_dim
    scale = math.log(10000.0) / (half_dim - 1)

    # Lane-dense fused layout: pad the single [sin | cos] axis to 128 lanes.
    width = ((out_dim + 127) // 128) * 128

    # Row tile: as large as possible while the (double-buffered) output tile
    # stays inside a conservative VMEM budget that fits every generation
    # (v7x: 64 MiB physical / 32 MiB default scoped). All values stay
    # multiples of 8 (sublane rule).
    rows8 = ((b + 7) // 8) * 8
    itemsize = jnp.dtype(out_dtype).itemsize
    vmem_budget = 16 * 1024 * 1024                       # out double-buffer target
    tb_cap = max(8, (vmem_budget // (2 * width * itemsize)) // 8 * 8)
    tb = min(rows8, 1024, tb_cap)
    rows_pad = ((b + tb - 1) // tb) * tb

    t = x.astype(jnp.float32).reshape(b, 1)
    if rows_pad != b:
        t = jnp.pad(t, ((0, rows_pad - b), (0, 0)))

    kernel = _make_sin_pos_emb_kernel(half_dim, width, scale, out_dtype)

    # TODO(synk): on v7x with large B (grid > 1) consider pltpu.CORE_PARALLEL
    # on the row axis to put both TensorCores on the HBM writeback.
    out = pl.pallas_call(
        kernel,
        out_shape=jax.ShapeDtypeStruct((rows_pad, width), out_dtype),
        grid_spec=pltpu.PrefetchScalarGridSpec(
            num_scalar_prefetch=0,
            grid=(rows_pad // tb,),
            in_specs=[pl.BlockSpec((tb, 1), lambda i: (i, 0))],      # timesteps
            out_specs=pl.BlockSpec((tb, width), lambda i: (i, 0)),   # [sin|cos]
        ),
        compiler_params=pltpu.CompilerParams(
            dimension_semantics=("parallel",),
            vmem_limit_bytes=32 * 1024 * 1024,
        ),
    )(t)

    # Fast paths: for lane-aligned dims the kernel output already IS the torch
    # result (no column slice, no concat); otherwise a single cheap slice.
    if width == out_dim:
        return out if rows_pad == b else out[:b]
    return out[:b, :out_dim]


def sinusoidal_pos_emb_reference(x, dim):
    half_dim = dim // 2
    scale = math.log(10000.0) / (half_dim - 1)
    freqs = jnp.exp(jnp.arange(half_dim, dtype=jnp.float32) * (-scale))
    emb = x.astype(jnp.float32)[:, None] * freqs[None, :]
    return jnp.concatenate([jnp.sin(emb), jnp.cos(emb)], axis=-1)


if __name__ == "__main__":
    key = jax.random.PRNGKey(0)
    k0, k1 = jax.random.split(key)

    # Shapes consistent with the module: a small batch of diffusion timesteps.
    B, dim = 8, 32                     # half_dim = 16, padded lane width = 128
    x = jax.random.uniform(k0, (B,), minval=0.0, maxval=1000.0,
                           dtype=jnp.float32)
    y = jax.block_until_ready(sinusoidal_pos_emb_pallas(x, dim))
    y_ref = sinusoidal_pos_emb_reference(x, dim)
    assert y.shape == (B, 2 * (dim // 2))
    # cos is computed as sin(arg + pi/2): allow tiny transcendental / argument
    # rounding differences vs the exact-cos reference.
    assert jnp.allclose(y, y_ref, atol=5e-4, rtol=1e-4)

    # Lane-aligned fast path (no column padding) plus row padding (B % 8 != 0).
    B2, dim2 = 20, 256
    x2 = jax.random.uniform(k1, (B2,), minval=0.0, maxval=1000.0,
                            dtype=jnp.float32)
    y2 = jax.block_until_ready(sinusoidal_pos_emb_pallas(x2, dim2))
    y2_ref = sinusoidal_pos_emb_reference(x2, dim2)
    assert y2.shape == (B2, 2 * (dim2 // 2))
    assert jnp.allclose(y2, y2_ref, atol=5e-4, rtol=1e-4)

    print("KERNEL_OK")
</pallas_src>

<mosaic_0001>
module attributes {stable_mosaic.version = 11 : i64} {
  func.func @kernel(%arg0: i32, %arg1: memref<8x1xf32, #tpu.memory_space<vmem>>, %arg2: memref<8x128xf32, #tpu.memory_space<vmem>>) attributes {dimension_semantics = [#tpu.dimension_semantics<parallel>], iteration_bounds = array<i64: 1>, scalar_prefetch = 0 : i64, scratch_operands = 0 : i64, tpu.core_type = #tpu.core_type<tc>, window_params = [{transform_indices = @transform_0, window_bounds = array<i64: 8, 1>}, {transform_indices = @transform_1, window_bounds = array<i64: 8, 128>}]} {
    %0 = tpu.iota {dimensions = array<i32: 1>} : vector<1x128xi32>
    %c16_i32 = arith.constant 16 : i32
    %1 = vector.broadcast %c16_i32 : i32 to vector<1x128xi32>
    %2 = arith.cmpi sge, %0, %1 : vector<1x128xi32>
    %c16_i32_0 = arith.constant 16 : i32
    %3 = vector.broadcast %c16_i32_0 : i32 to vector<1x128xi32>
    %4 = arith.subi %0, %3 : vector<1x128xi32>
    %5 = arith.select %2, %4, %0 : vector<1x128xi1>, vector<1x128xi32>
    %6 = arith.sitofp %5 : vector<1x128xi32> to vector<1x128xf32>
    %cst = arith.constant -0.614022672 : f32
    %7 = vector.broadcast %cst : f32 to vector<1x128xf32>
    %8 = arith.mulf %6, %7 : vector<1x128xf32>
    %9 = math.exp %8 : vector<1x128xf32>
    %cst_1 = arith.constant 1.57079637 : f32
    %cst_2 = arith.constant 0.000000e+00 : f32
    %10 = vector.broadcast %cst_1 : f32 to vector<1x128xf32>
    %11 = vector.broadcast %cst_2 : f32 to vector<1x128xf32>
    %12 = arith.select %2, %10, %11 : vector<1x128xi1>, vector<1x128xf32>
    %c0 = arith.constant 0 : index
    %c0_3 = arith.constant 0 : index
    %13 = vector.load %arg1[%c0, %c0_3] : memref<8x1xf32, #tpu.memory_space<vmem>>, vector<8x1xf32>
    %14 = vector.broadcast %13 : vector<8x1xf32> to vector<8x128xf32>
    %15 = vector.broadcast %9 : vector<1x128xf32> to vector<8x128xf32>
    %16 = arith.mulf %14, %15 : vector<8x128xf32>
    %17 = vector.broadcast %12 : vector<1x128xf32> to vector<8x128xf32>
    %18 = arith.addf %16, %17 : vector<8x128xf32>
    %19 = math.sin %18 : vector<8x128xf32>
    %c0_4 = arith.constant 0 : index
    %c0_5 = arith.constant 0 : index
    %20 = vector.load %arg2[%c0_4, %c0_5] : memref<8x128xf32, #tpu.memory_space<vmem>>, vector<8x128xf32>
    tpu.vector_store %arg2[%c0_4, %c0_5], %19 {strides = array<i32>} : memref<8x128xf32, #tpu.memory_space<vmem>>, vector<8x128xf32>,
    return
  }
  func.func @transform_0(%arg0: i32) -> (i32, i32) {
    %c0_i32 = arith.constant 0 : i32
    %c0_i32_0 = arith.constant 0 : i32
    return %arg0, %c0_i32 : i32, i32
  }
  func.func @transform_1(%arg0: i32) -> (i32, i32) {
    %c0_i32 = arith.constant 0 : i32
    %c0_i32_0 = arith.constant 0 : i32
    return %arg0, %c0_i32 : i32, i32
  }
}

</mosaic_0001>

<bundles_post_ra>
// kernel: tpu_custom_call.1
= control target key start
LH: loop header
LB: loop body
LE: loop exit
PB: predicated region body
PF: predicated region fallthrough
CT: control target
= control target key end

     0   :  { %v195_v1 = vmov 0   ;;  %s250_s0 = inlined_call_operand.vmem [shape: f32[8,1], index: 0, kind: input, shape index: {}]   ;;  %s251_s1 = inlined_call_operand.hbm [shape: f32[8,128], index: 1, kind: output, shape index: {}]  }
   0x1   :  { %v19_v0 = vld [vmem:[%s250_s0] sm:$0xff]  ;;  %164 = vset.pattern.permute.xlu0 %v195_v1 }
   0x2   :  { %6 = vsyncpa [#allocation3], 0  ;;  %22 = vperm.xlu0 %164, %v19_v0   ;;  %v9_v2 = vlaneseq  ;;  %v196_v11 = vmov 0.0   ;;  %v197_v26 = vmov 2102212464   ;;  %s203_s0 = smov [#allocation2]  }
   0x3   :  { %v198_v28 = vmov 920167782   ;;  %v199_v32 = vmov 1326507024   ;;  %v200_v34 = vmov 683565275  }
   0x4   :  { %v10_v3 = vand.u32 127, %v9_v2  ;;  %v201_v36 = vmov 2475754826   ;;  %v202_v39 = vmov 2131351028   ;;  %s138_s8 = sshll.u32 %s203_s0, 4  ;;  %s139_s8 = int_to_ptr.vmem [resolvable:$true] %s138_s8 }
   0x5   :  { %s171_s9 = scalar_lea.vmem %s139_s8, 128  ;;  %p176_p1 = scmp.lt.s32.totalorder %s139_s8, %s139_s8 }
   0x6   :  { %v146_v4 = vadd.s32 4294967280, %v10_v3  ;;  %vm11_vm0 = vcmp.ge.s32.totalorder %v10_v3, 16  ;;  %p172_p0 = scmp.ne.s32.totalorder %s139_s8, %s171_s9  ;;  %p177_p2 = scmp.lt.s32.totalorder %s171_s9, %s171_s9 }
   0x7   :  { %v18_v12 = vsel %vm11_vm0, 1.5707964, %v196_v11 }
   0x8   :  { %v13_v5 = vsel %vm11_vm0, %v146_v4, %v10_v3  ;;  %p178_p3 = por %p177_p2, %p176_p1 }
   0x9   :  { %v14_v6 = vcvt.s32.f32 %v13_v5 }
   0xa   :  { %p179_p4 = pnand %p178_p3, %p172_p0 }
   0xb   :  { %v15_v7 = vmul.f32 -0.6140227, %v14_v6 }
   0xd   :  { %v16_v8 = vmul.f32 1.442695, %v15_v7 }
   0xf   :  { %165 = vpow2.f32 %v16_v8 }
  0x19   :  { %v166_v9 = vpop.eup %165 }
  0x81   :  { %v23_v10 = vpop.permute.xlu0 %22 }
  0x82   :  { %v25_v13 = vmul.f32 %v166_v9, %v23_v10 }
  0x84   :  { %v217_v14 = vadd.f32 %v25_v13, %v18_v12 }
  0x86   :  { %v30_v15 = vand.u32 2139095040, %v217_v14  ;;  %v27_v16 = vand.u32 2147483647, %v217_v14  ;;  %vm29_vm8 = vcmp.lt.s32.totalorder %v217_v14, 0  ;;  %vm119_vm13 = vweird.f32 %v217_v14 }
  0x88   :  { %v31_v17 = vshrl.u32 %v30_v15, 23  ;;  %v34_v19 = vand.u32 8388607, %v27_v16  ;;  %vm28_vm9 = vcmp.le.f32.partialorder %v27_v16, 0.7853982 }
  0x8a   :  { %v147_v18 = vadd.s32 4294967169, %v31_v17  ;;  %v35_v22 = vor.u32 8388608, %v34_v19 }
  0x8c   :  { %v37_v20 = vadd.s32 1, %v147_v18  ;;  %v75_v30 = vshll.u32 %v35_v22, 8 }
  0x8e   :  { %vm38_vm1 = vcmp.gt.s32.totalorder %v37_v20, 0 }
  0x8f   :  { %v39_v21 = vsel %vm38_vm1, %v37_v20, 0 }
  0x90   :  { %v41_v23 = vand.u32 31, %v39_v21  ;;  %v40_v24 = vshrl.u32 %v39_v21, 5 }
  0x92   :  { %v42_v25 = vsub.s32 32, %v41_v23  ;;  %v53_v27 = vshll.u32 %v197_v26, %v41_v23  ;;  %v56_v29 = vshll.u32 %v198_v28, %v41_v23  ;;  %v44_v35 = vshll.u32 %v200_v34, %v41_v23 }
  0x93   :  { %v47_v38 = vshll.u32 %v201_v36, %v41_v23  ;;  %v50_v41 = vshll.u32 %v202_v39, %v41_v23  ;;  %vm62_vm2 = vcmp.lt.s32.totalorder %v40_v24, 4  ;;  %vm59_vm3 = vcmp.lt.s32.totalorder %v40_v24, 1 }
  0x94   :  { %v54_v31 = vshrl.u32 %v198_v28, %v42_v25  ;;  %v57_v33 = vshrl.u32 %v199_v32, %v42_v25  ;;  %v45_v37 = vshrl.u32 %v201_v36, %v42_v25  ;;  %v48_v40 = vshrl.u32 %v202_v39, %v42_v25 }
  0x95   :  { %v51_v42 = vshrl.u32 %v197_v26, %v42_v25  ;;  %v43_v46 = vshrl.u32 %v200_v34, %v42_v25  ;;  %vm60_vm4 = vcmp.lt.s32.totalorder %v40_v24, 2  ;;  %vm61_vm5 = vcmp.lt.s32.totalorder %v40_v24, 3 }
  0x96   :  { %v55_v43 = vor.u32 %v54_v31, %v53_v27  ;;  %v58_v44 = vor.u32 %v57_v33, %v56_v29  ;;  %v46_v45 = vor.u32 %v45_v37, %v44_v35  ;;  %v49_v47 = vor.u32 %v48_v40, %v47_v38 }
  0x97   :  { %v52_v48 = vor.u32 %v51_v42, %v50_v41 }
  0x98   :  { %v68_v49 = vsel %vm62_vm2, %v55_v43, 920167782  ;;  %v72_v50 = vsel %vm62_vm2, %v58_v44, 1326507024  ;;  %v67_v52 = vsel %vm59_vm3, %v46_v45, %v49_v47  ;;  %v63_v55 = vsel %vm59_vm3, %v43_v46, %v46_v45 }
  0x99   :  { %v64_v51 = vsel %vm62_vm2, %v52_v48, 2102212464  ;;  %v69_v53 = vsel %vm61_vm5, %v52_v48, %v68_v49  ;;  %v71_v54 = vsel %vm59_vm3, %v49_v47, %v52_v48  ;;  %v73_v58 = vsel %vm61_vm5, %v55_v43, %v72_v50 }
  0x9a   :  { %v65_v56 = vsel %vm61_vm5, %v49_v47, %v64_v51  ;;  %v70_v57 = vsel %vm60_vm4, %v67_v52, %v69_v53  ;;  %v74_v59 = vsel %vm60_vm4, %v71_v54, %v73_v58 }
  0x9b   :  { %v223_v60 = vmul.u32.u64.low %v75_v30, %v70_v57  ;;  %v224_v61 = vmul.u32.u64.high %v75_v30, %v70_v57, %v223_v60  ;;  %v226_v62 = vmul.u32.u64.low %v75_v30, %v74_v59  ;;  %v227_v63 = vmul.u32.u64.high %v75_v30, %v74_v59, %v226_v62 }
  0x9c   :  { %v66_v0 = vsel %vm60_vm4, %v63_v55, %v65_v56 }
  0x9d   :  { %v85_v1 = vadd.s32 1, %v224_v61  ;;  %v82_v2 = vmul.u32 %v75_v30, %v66_v0  ;;  %vm84_vm6 = vc.u32 %v227_v63, %v223_v60  ;;  %v83_v15 = vadd.s32 %v223_v60, %v227_v63 }
  0x9f   :  { %v86_v3 = vsel %vm84_vm6, %v85_v1, %v224_v61 }
  0xa0   :  { %v87_v4 = vadd.s32 %v86_v3, %v82_v2 }
  0xa2   :  { %v88_v5 = vadd.s32 536870912, %v87_v4 }
  0xa4   :  { %v89_v6 = vshrl.u32 %v88_v5, 30 }
  0xa6   :  { %v90_v7 = vshll.u32 %v89_v6, 30  ;;  %v113_v28 = vsub.s32 4, %v89_v6 }
  0xa8   :  { %v91_v8 = vsub.s32 %v87_v4, %v90_v7  ;;  %v114_v31 = vsel %vm29_vm8, %v113_v28, %v89_v6 }
  0xa9   :  { %v116_v33 = vsel %vm28_vm9, 0, %v114_v31 }
  0xaa   :  { %v93_v9 = vsub.s32 0, %v91_v8  ;;  %v120_v34 = vadd.s32 3, %v116_v33 }
  0xac   :  { %v148_v10 = vmin.u32 %v93_v9, %v91_v8  ;;  %v121_v35 = vand.u32 3, %v120_v34 }
  0xae   :  { %v95_v11 = vclz %v148_v10  ;;  %vm126_vm10 = vcmp.eq.s32.totalorder %v121_v35, 2  ;;  %vm123_vm11 = vcmp.eq.s32.totalorder %v121_v35, 0  ;;  %vm122_vm12 = vcmp.lt.s32.totalorder %v121_v35, 2 }
  0xb0   :  { %v149_v12 = vadd.s32 4294967294, %v95_v11 }
  0xb2   :  { %vm150_vm7 = vcmp.lt.s32.totalorder %v149_v12, 0 }
  0xb3   :  { %v98_v13 = vsel %vm150_vm7, 0, %v149_v12 }
  0xb4   :  { %v99_v17 = vsub.s32 32, %v98_v13  ;;  %v103_v18 = vsub.s32 4294967266, %v98_v13  ;;  %v100_v19 = vshll.u32 %v91_v8, %v98_v13 }
  0xb6   :  { %v101_v20 = vshrl.u32 %v83_v15, %v99_v17  ;;  %v104_v21 = vadd.s32 127, %v103_v18 }
  0xb8   :  { %v102_v22 = vor.u32 %v101_v20, %v100_v19  ;;  %v105_v23 = vshll.u32 %v104_v21, 23 }
  0xba   :  { %v106_v24 = vor.u32 4788187, %v105_v23  ;;  %v109_v26 = vcvt.s32.f32 %v102_v22 }
  0xbc   :  { %v107_v25 = vand.u32 2147483647, %v106_v24 }
  0xbe   :  { %v110_v27 = vmul.f32 %v109_v26, %v107_v25 }
  0xc0   :  { %v111_v29 = vxor.u32 2147483648, %v110_v27 }
  0xc2   :  { %v112_v30 = vsel %vm29_vm8, %v111_v29, %v110_v27 }
  0xc3   :  { %v115_v32 = vsel %vm28_vm9, %v217_v14, %v112_v30 }
  0xc4   :  { %167 = vcosq.f32 %v115_v32 }
  0xc5   :  { %169 = vsinq.f32 %v115_v32 }
  0xce   :  { %v168_v36 = vpop.eup %167 }
  0xcf   :  { %v170_v37 = vpop.eup %169  ;;  %v127_v38 = vxor.u32 2147483648, %v168_v36 }
  0xd0   :  { %v124_v39 = vxor.u32 2147483648, %v170_v37 }
  0xd1   :  { %v128_v40 = vsel %vm126_vm10, %v127_v38, %v170_v37 }
  0xd2   :  { %v125_v16 = vsel %vm123_vm11, %v168_v36, %v124_v39 }
  0xd3   :  { %v129_v41 = vsel %vm122_vm12, %v125_v16, %v128_v40 }
  0xd4   :  { %v130_v42 = vsel %vm119_vm13, nan, %v129_v41 }
  0xd5   :  { %131 = vst [vmem:[#allocation2] sm:$0xff] %v130_v42 }
  0xd6   :  { %182 = shalt.err (!%p179_p4)
}
  0xd7   :  { %s183_s12 = scalar_lea.hbm %s251_s1, 128 }
  0xd8   :  { %p184_p5 = scmp.ne.s32.totalorder %s251_s1, %s183_s12  ;;  %p187_p6 = scmp.lt.u32.totalorder %s183_s12, %s251_s1 }
  0xda   :  { %p189_p7 = pnand %p187_p6, %p184_p5 }
  0xdc   :  { %192 = shalt.err (!%p189_p7)
}
  0xdd   :  { %141 = dma.vmem_to_hbm [thread:$0]  %s139_s8, 128, %s251_s1, [#allocation3]  }
  0xde   :  { %193 = dma.done.wait [#allocation3], 128  }
  0xdf   :  { %194 = vsyncadd [#allocation3], 4294967168 }
  0xe0   :  { %145 = vsyncpa [#allocation3], 1 }

</bundles_post_ra>
